<compile_context>
chip_gen: v5e
topology: v5e:2x2
jax: 0.10.0
libtpu: 0.0.40
codegen_flags: <defaults>
</compile_context>

<pallas_src>
import jax
import jax.numpy as jnp
from jax.experimental import pallas as pl
from jax.experimental.pallas import tpu as pltpu


def _round_up(x, m):
    return ((x + m - 1) // m) * m


def model_wrapper_kernel(x_ref, w_ref, b_ref, o_ref):
    # x_ref : (tm, tk) bf16  pre-clamped, flattened input tile
    # w_ref : (tk, tn) bf16  normalizer-folded weight tile
    # b_ref : (1,  tn) f32   normalizer-folded bias tile
    # o_ref : (tm, tn) f32   logits tile; resident across the reduction axis
    kd = pl.program_id(2)

    @pl.when(kd == 0)
    def _init():
        # Initialize the resident output block with the broadcast bias so no
        # separate accumulator scratch or finalize copy is needed.
        o_ref[...] = jnp.broadcast_to(b_ref[...], o_ref.shape)

    o_ref[...] += jnp.dot(
        x_ref[...], w_ref[...], preferred_element_type=jnp.float32
    )


def build_model_wrapper(
    mean_c, std_c, weight, bias, image_shape,
    *, weight_dtype=jnp.bfloat16, x_dtype=jnp.bfloat16,
):
    """Fold/pad/cast the parameters once and return a fast forward callable."""
    c, h, w = image_shape
    d = c * h * w
    k = int(bias.shape[0])
    assert weight.shape == (d, k)

    # ---- tile geometry along D and K (decided once) ----
    # Class axis: lane-dense; one tile covers the whole padded class dim up to
    # 1024 so the X stream is never repeated across the class axis.
    k_pad = min(1024, _round_up(k, 128))
    if k > k_pad:
        k_pad = _round_up(k, 1024)
    tn0 = min(1024, k_pad)
    # Reduction axis: collapse entirely for small D (one dot per output tile,
    # no init/accumulate steps); otherwise 2048-wide chunks.
    if d <= 2048:
        tk = _round_up(d, 256)
        d_pad = tk
    else:
        tk = 2048
        d_pad = _round_up(d, tk)

    # ---- fold the normalizer affine into W/b (hoisted out of forward) ----
    hw = h * w
    inv_std_row = jnp.repeat(1.0 / std_c.astype(jnp.float32), hw)    # (D,)
    mean_row = jnp.repeat(mean_c.astype(jnp.float32), hw)            # (D,)
    w_f32 = weight.astype(jnp.float32)
    w_folded = inv_std_row[:, None] * w_f32                          # (D, K)
    b_folded = bias.astype(jnp.float32) - (mean_row * inv_std_row) @ w_f32

    w_p = (
        jnp.zeros((d_pad, k_pad), jnp.float32)
        .at[:d, :k].set(w_folded)
        .astype(weight_dtype)
    )
    b_p = jnp.zeros((1, k_pad), jnp.float32).at[0, :k].set(b_folded)

    x_bytes = jnp.dtype(x_dtype).itemsize
    w_bytes = jnp.dtype(weight_dtype).itemsize

    @jax.jit
    def forward(x_nchw):
        n = x_nchw.shape[0]
        # Batch tile: as large as N allows (<=256) so the dominant weight
        # stream is read only n_pad/tm times; multiple of 16 for bf16 packing.
        tm = min(256, _round_up(n, 16))
        n_pad = _round_up(n, tm)
        tn = tn0
        # Megacore (v7x has 2 TCs): try to provide >=2 parallel grid units,
        # but only when both halves would contain real (non-padding) work.
        if (n_pad // tm) * (k_pad // tn) < 2:
            if tn >= 256 and k > tn // 2:
                tn //= 2
            elif tm >= 32 and n > tm // 2:
                tm //= 2
                n_pad = _round_up(n, tm)

        # Clamp (InputNormalize) once, in f32, fused by XLA into the single
        # cast/pad pass over X; the affine part is already folded into W/b.
        x_flat = jnp.clip(x_nchw.astype(jnp.float32), 0.0, 1.0).reshape(n, d)
        x_p = (
            jnp.zeros((n_pad, d_pad), x_dtype)
            .at[:n, :d].set(x_flat.astype(x_dtype))
        )

        grid = (n_pad // tm, k_pad // tn, d_pad // tk)

        # Double-buffered VMEM footprint (inputs + bias + output); keep far
        # below v7x's 64 MiB physical VMEM and set the scoped limit explicitly.
        vmem_bytes = 2 * (
            tm * tk * x_bytes + tk * tn * w_bytes + 8 * tn * 4 + tm * tn * 4
        )
        vmem_limit = int(min(56 << 20, max(2 * vmem_bytes, 16 << 20)))

        cost = pl.CostEstimate(
            flops=2 * n_pad * d_pad * k_pad,
            transcendentals=0,
            bytes_accessed=(
                n_pad * d_pad * x_bytes * (k_pad // tn)     # X stream
                + d_pad * k_pad * w_bytes * (n_pad // tm)   # W stream (dominant)
                + n_pad * k_pad * 4                         # logits
                + k_pad * 4 * (n_pad // tm)                 # bias
            ),
        )

        out = pl.pallas_call(
            model_wrapper_kernel,
            out_shape=jax.ShapeDtypeStruct((n_pad, k_pad), jnp.float32),
            grid_spec=pltpu.PrefetchScalarGridSpec(
                num_scalar_prefetch=0,
                grid=grid,
                in_specs=[
                    pl.BlockSpec((tm, tk), lambda i, j, kd: (i, kd)),
                    pl.BlockSpec((tk, tn), lambda i, j, kd: (kd, j)),
                    pl.BlockSpec((1, tn), lambda i, j, kd: (0, j)),
                ],
                out_specs=pl.BlockSpec((tm, tn), lambda i, j, kd: (i, j)),
            ),
            compiler_params=pltpu.CompilerParams(
                dimension_semantics=("parallel", "parallel", "arbitrary"),
                vmem_limit_bytes=vmem_limit,
            ),
            cost_estimate=cost,
        )(x_p, w_p, b_p)

        return out[:n, :k]

    return forward


def reference_forward(x_nchw, mean_c, std_c, weight, bias):
    """Pure-JAX f32 reference matching the PyTorch module semantics."""
    x = jnp.clip(x_nchw.astype(jnp.float32), 0.0, 1.0)
    xn = (x - mean_c[None, :, None, None]) / std_c[None, :, None, None]
    n = x.shape[0]
    return xn.reshape(n, -1) @ weight.astype(jnp.float32) + bias[None, :]


if __name__ == "__main__":
    key = jax.random.PRNGKey(0)
    k_x, k_w, k_b = jax.random.split(key, 3)

    # Small image-like NCHW input; C=3 matches the normalizer's default buffers.
    N, C, H, W = 2, 3, 16, 16
    K = 10  # classes of the synthetic inner linear model

    x = jax.random.uniform(
        k_x, (N, C, H, W), dtype=jnp.float32, minval=-0.2, maxval=1.2
    )  # exercises the clamp
    mean_c = jnp.array([0.485, 0.456, 0.406], dtype=jnp.float32)
    std_c = jnp.array([0.229, 0.224, 0.225], dtype=jnp.float32)

    D = C * H * W
    weight = 0.02 * jax.random.normal(k_w, (D, K), dtype=jnp.float32)
    bias = 0.01 * jax.random.normal(k_b, (K,), dtype=jnp.float32)

    forward = build_model_wrapper(mean_c, std_c, weight, bias, (C, H, W))
    out = jax.block_until_ready(forward(x))

    ref = reference_forward(x, mean_c, std_c, weight, bias)
    assert out.shape == (N, K)
    # Tolerance covers bf16 X/W streaming + the folded summation order.
    assert jnp.allclose(out, ref, atol=5e-2, rtol=5e-2)

    print("KERNEL_OK")
</pallas_src>

<mosaic_0001>
module attributes {stable_mosaic.version = 11 : i64} {
  func.func @model_wrapper_kernel(%arg0: i32, %arg1: i32, %arg2: i32, %arg3: memref<16x768xbf16, #tpu.memory_space<vmem>>, %arg4: memref<768x128xbf16, #tpu.memory_space<vmem>>, %arg5: memref<1x128xf32, #tpu.memory_space<vmem>>, %arg6: memref<16x128xf32, #tpu.memory_space<vmem>>) attributes {dimension_semantics = [#tpu.dimension_semantics<parallel>, #tpu.dimension_semantics<parallel>, #tpu.dimension_semantics<arbitrary>], iteration_bounds = array<i64: 1, 1, 1>, scalar_prefetch = 0 : i64, scratch_operands = 0 : i64, tpu.core_type = #tpu.core_type<tc>, window_params = [{transform_indices = @transform_0, window_bounds = array<i64: 16, 768>}, {transform_indices = @transform_1, window_bounds = array<i64: 768, 128>}, {transform_indices = @transform_2, window_bounds = array<i64: 1, 128>}, {transform_indices = @transform_3, window_bounds = array<i64: 16, 128>}]} {
    %c0_i32 = arith.constant 0 : i32
    %0 = arith.cmpi eq, %arg2, %c0_i32 : i32
    %1 = arith.extui %0 : i1 to i32
    %c0_i32_0 = arith.constant 0 : i32
    %2 = arith.cmpi ne, %1, %c0_i32_0 : i32
    scf.if %2 {
      %c0_8 = arith.constant 0 : index
      %c0_9 = arith.constant 0 : index
      %9 = vector.load %arg5[%c0_8, %c0_9] : memref<1x128xf32, #tpu.memory_space<vmem>>, vector<1x128xf32>
      %10 = vector.shape_cast %9 : vector<1x128xf32> to vector<1x128xf32>
      %11 = vector.broadcast %10 : vector<1x128xf32> to vector<16x128xf32>
      %c0_10 = arith.constant 0 : index
      %c0_11 = arith.constant 0 : index
      %12 = vector.load %arg6[%c0_10, %c0_11] : memref<16x128xf32, #tpu.memory_space<vmem>>, vector<16x128xf32>
      tpu.vector_store %arg6[%c0_10, %c0_11], %11 {strides = array<i32>} : memref<16x128xf32, #tpu.memory_space<vmem>>, vector<16x128xf32>,
    } else {
    }
    %c0 = arith.constant 0 : index
    %c0_1 = arith.constant 0 : index
    %3 = vector.load %arg6[%c0, %c0_1] : memref<16x128xf32, #tpu.memory_space<vmem>>, vector<16x128xf32>
    %c0_2 = arith.constant 0 : index
    %c0_3 = arith.constant 0 : index
    %4 = vector.load %arg3[%c0_2, %c0_3] : memref<16x768xbf16, #tpu.memory_space<vmem>>, vector<16x768xbf16>
    %c0_4 = arith.constant 0 : index
    %c0_5 = arith.constant 0 : index
    %5 = vector.load %arg4[%c0_4, %c0_5] : memref<768x128xbf16, #tpu.memory_space<vmem>>, vector<768x128xbf16>
    %cst = arith.constant dense<0.000000e+00> : vector<16x128xf32>
    %6 = tpu.matmul %4, %5, %cst {dimension_numbers = #tpu.dot_dimension_numbers<[1], [0], [0], [1], [0, 0, 1, 1], [], []>} : vector<16x768xbf16>, vector<768x128xbf16>, vector<16x128xf32> -> vector<16x128xf32>
    %7 = arith.addf %3, %6 : vector<16x128xf32>
    %c0_6 = arith.constant 0 : index
    %c0_7 = arith.constant 0 : index
    %8 = vector.load %arg6[%c0_6, %c0_7] : memref<16x128xf32, #tpu.memory_space<vmem>>, vector<16x128xf32>
    tpu.vector_store %arg6[%c0_6, %c0_7], %7 {strides = array<i32>} : memref<16x128xf32, #tpu.memory_space<vmem>>, vector<16x128xf32>,
    return
  }
  func.func @transform_0(%arg0: i32, %arg1: i32, %arg2: i32) -> (i32, i32) {
    %c0_i32 = arith.constant 0 : i32
    return %arg0, %arg2 : i32, i32
  }
  func.func @transform_1(%arg0: i32, %arg1: i32, %arg2: i32) -> (i32, i32) {
    %c0_i32 = arith.constant 0 : i32
    return %arg2, %arg1 : i32, i32
  }
  func.func @transform_2(%arg0: i32, %arg1: i32, %arg2: i32) -> (i32, i32) {
    %c0_i32 = arith.constant 0 : i32
    %c0_i32_0 = arith.constant 0 : i32
    return %c0_i32, %arg1 : i32, i32
  }
  func.func @transform_3(%arg0: i32, %arg1: i32, %arg2: i32) -> (i32, i32) {
    %c0_i32 = arith.constant 0 : i32
    return %arg0, %arg1 : i32, i32
  }
}

</mosaic_0001>

<bundles_post_ra>
// kernel: forward.1
= control target key start
LH: loop header
LB: loop body
LE: loop exit
PB: predicated region body
PF: predicated region fallthrough
CT: control target
= control target key end

     0   :  { %8 = vsyncpa [#allocation3], 0  ;;  %s855_s15 = smov [#allocation2]   ;;  %s856_s17 = smov 64   ;;  %s926_s0 = inlined_call_operand.vmem [shape: bf16[16,768], index: 0, kind: input, shape index: {}]   ;;  %s927_s1 = inlined_call_operand.hbm [shape: bf16[768,128], index: 1, kind: input, shape index: {}]   ;;  %s928_s2 = inlined_call_operand.vmem [shape: f32[1,128], index: 2, kind: input, shape index: {}]   ;;  %s929_s3 = inlined_call_operand.vmem [shape: f32[16,128], index: 3, kind: output, shape index: {}]  }
   0x1   :  { %s15_s14 = sshll.u32 %s927_s1, 4  ;;  %s17_s16 = sshll.u32 %s855_s15, 4  ;;  %s16_s14 = int_to_ptr.hbm [resolvable:$true] %s15_s14  ;;  %s18_s16 = int_to_ptr.vmem [resolvable:$true] %s17_s16 }
   0x2   :  { %s857_s18 = smov 4  }
   0x3   :  { %23 = dma.hbm_to_vmem [thread:$0]  %s16_s14, 6144, %s18_s16, [#allocation3], %s856_s17, %s856_s17, %s857_s18  }
   0x4   :  { %853 = dma.done.wait [#allocation3], 6144  }
   0x5   :  { %854 = vsyncadd [#allocation3], 4294961152  ;;  %v784_v0 = vld [vmem:[#allocation2 + $0x38] sm:$0xff]  ;;  %v783_v4 = vld [vmem:[#allocation2 + $0x30] sm:$0xff] }
   0x6   :  { %v792_v1 = vld [vmem:[#allocation2 + $0x78] sm:$0xff]  ;;  %462 = vmatpush.bf16.msra.mxu0 %v784_v0  ;;  %v791_v5 = vld [vmem:[#allocation2 + $0x70] sm:$0xff]  ;;  %v782_v8 = vld [vmem:[#allocation2 + $0x28] sm:$0xff] }
   0x7   :  { %v800_v2 = vld [vmem:[#allocation2 + $0xb8] sm:$0xff]  ;;  %476 = vmatpush.bf16.msra.mxu1 %v792_v1  ;;  %v799_v6 = vld [vmem:[#allocation2 + $0xb0] sm:$0xff]  ;;  %v790_v9 = vld [vmem:[#allocation2 + $0x68] sm:$0xff] }
   0x8   :  { %v808_v3 = vld [vmem:[#allocation2 + $0xf8] sm:$0xff]  ;;  %490 = vmatpush.bf16.msra.mxu2 %v800_v2  ;;  %v807_v7 = vld [vmem:[#allocation2 + $0xf0] sm:$0xff]  ;;  %v798_v10 = vld [vmem:[#allocation2 + $0xa8] sm:$0xff] }
   0x9   :  { %504 = vmatpush.bf16.msra.mxu3 %v808_v3  ;;  %v806_v11 = vld [vmem:[#allocation2 + $0xe8] sm:$0xff]  ;;  %v781_v12 = vld [vmem:[#allocation2 + $0x20] sm:$0xff]  ;;  %v780_v16 = vld [vmem:[#allocation2 + $0x18] sm:$0xff] }
   0xa   :  { %463 = vmatpush.bf16.msra.mxu0 %v783_v4  ;;  %v789_v13 = vld [vmem:[#allocation2 + $0x60] sm:$0xff]  ;;  %v788_v17 = vld [vmem:[#allocation2 + $0x58] sm:$0xff]  ;;  %v779_v20 = vld [vmem:[#allocation2 + $0x10] sm:$0xff] }
   0xb   :  { %477 = vmatpush.bf16.msra.mxu1 %v791_v5  ;;  %v797_v14 = vld [vmem:[#allocation2 + $0xa0] sm:$0xff]  ;;  %v796_v18 = vld [vmem:[#allocation2 + $0x98] sm:$0xff]  ;;  %v787_v21 = vld [vmem:[#allocation2 + $0x50] sm:$0xff] }
   0xc   :  { %491 = vmatpush.bf16.msra.mxu2 %v799_v6  ;;  %v805_v15 = vld [vmem:[#allocation2 + $0xe0] sm:$0xff]  ;;  %v804_v19 = vld [vmem:[#allocation2 + $0xd8] sm:$0xff]  ;;  %v795_v22 = vld [vmem:[#allocation2 + $0x90] sm:$0xff] }
   0xd   :  { %505 = vmatpush.bf16.msra.mxu3 %v807_v7  ;;  %v803_v23 = vld [vmem:[#allocation2 + $0xd0] sm:$0xff]  ;;  %v778_v24 = vld [vmem:[#allocation2 + $0x8] sm:$0xff]  ;;  %v777_v28 = vld [vmem:[#allocation2] sm:$0xff] }
   0xe   :  { %464 = vmatpush.bf16.msra.mxu0 %v782_v8  ;;  %v786_v25 = vld [vmem:[#allocation2 + $0x48] sm:$0xff]  ;;  %v785_v29 = vld [vmem:[#allocation2 + $0x40] sm:$0xff]  ;;  %v816_v31 = vld [vmem:[#allocation2 + $0x138] sm:$0xff] }
   0xf   :  { %478 = vmatpush.bf16.msra.mxu1 %v790_v9  ;;  %v794_v26 = vld [vmem:[#allocation2 + $0x88] sm:$0xff]  ;;  %v793_v30 = vld [vmem:[#allocation2 + $0x80] sm:$0xff]  ;;  %v774_v33 = vld [vmem:[%s926_s0 + $0x14] sm:$0xf0] }
  0x10   :  { %492 = vmatpush.bf16.msra.mxu2 %v798_v10  ;;  %v802_v27 = vld [vmem:[#allocation2 + $0xc8] sm:$0xff]  ;;  %v557_v32 = vld [vmem:[%s926_s0] sm:$0xf]  ;;  %v771_v34 = vld [vmem:[%s926_s0 + $0x4] sm:$0xf] }
  0x11   :  { %506 = vmatpush.bf16.msra.mxu3 %v806_v11  ;;  %v559_v35 = vld [vmem:[%s926_s0 + $0x18] sm:$0xf0]  ;;  %v565_v37 = vld [vmem:[%s926_s0 + $0x8] sm:$0xf]  ;;  %v775_v38 = vld [vmem:[%s926_s0 + $0x1c] sm:$0xf0]  ;;  %v558_v42 = vor.u32 %v774_v33, %v557_v32 }
  0x12   :  { %465 = vmatpush.bf16.msra.mxu0 %v781_v12  ;;  %v824_v36 = vld [vmem:[#allocation2 + $0x178] sm:$0xff]  ;;  %v801_v39 = vld [vmem:[#allocation2 + $0xc0] sm:$0xff]  ;;  %v772_v40 = vld [vmem:[%s926_s0 + $0xc] sm:$0xf]  ;;  %v562_v43 = vor.u32 %v771_v34, %v559_v35  ;;  %v566_v44 = vor.u32 %v775_v38, %v565_v37 }
  0x13   :  { %479 = vmatpush.bf16.msra.mxu1 %v789_v13  ;;  %v567_v41 = vld [vmem:[%s926_s0 + $0x20] sm:$0xf0]  ;;  %v815_v45 = vld [vmem:[#allocation2 + $0x130] sm:$0xff]  ;;  %v814_v48 = vld [vmem:[#allocation2 + $0x128] sm:$0xff] }
  0x14   :  { %493 = vmatpush.bf16.msra.mxu2 %v797_v14  ;;  %v570_v46 = vor.u32 %v772_v40, %v567_v41  ;;  %v823_v47 = vld [vmem:[#allocation2 + $0x170] sm:$0xff]  ;;  %v822_v49 = vld [vmem:[#allocation2 + $0x168] sm:$0xff]  ;;  %v813_v50 = vld [vmem:[#allocation2 + $0x120] sm:$0xff] }
  0x15   :  { %507 = vmatpush.bf16.msra.mxu3 %v805_v15  ;;  %v821_v51 = vld [vmem:[#allocation2 + $0x160] sm:$0xff]  ;;  %v812_v52 = vld [vmem:[#allocation2 + $0x118] sm:$0xff]  ;;  %v811_v54 = vld [vmem:[#allocation2 + $0x110] sm:$0xff] }
  0x16   :  { %466 = vmatpush.bf16.msra.mxu0 %v780_v16  ;;  %v820_v53 = vld [vmem:[#allocation2 + $0x158] sm:$0xff]  ;;  %v819_v55 = vld [vmem:[#allocation2 + $0x150] sm:$0xff]  ;;  %v810_v56 = vld [vmem:[#allocation2 + $0x108] sm:$0xff] }
  0x17   :  { %480 = vmatpush.bf16.msra.mxu1 %v788_v17  ;;  %v818_v57 = vld [vmem:[#allocation2 + $0x148] sm:$0xff]  ;;  %v809_v58 = vld [vmem:[#allocation2 + $0x100] sm:$0xff]  ;;  %v573_v59 = vld [vmem:[%s926_s0 + $0x10] sm:$0xf] }
  0x18   :  { %494 = vmatpush.bf16.msra.mxu2 %v796_v18  ;;  %v776_v60 = vld [vmem:[%s926_s0 + $0x24] sm:$0xf0]  ;;  %v817_v61 = vld [vmem:[#allocation2 + $0x140] sm:$0xff]  ;;  %v773_v62 = vld [vmem:[%s926_s0 + $0x14] sm:$0xf] }
  0x19   :  { %508 = vmatpush.bf16.msra.mxu3 %v804_v19  ;;  %v575_v63 = vld [vmem:[%s926_s0 + $0x28] sm:$0xf0]  ;;  %v574_v0 = vor.u32 %v776_v60, %v573_v59  ;;  %v828_v15 = vld [vmem:[%s928_s2] ss:$0 sm:$0xff] }
  0x1a   :  { %467 = vmatpush.bf16.msra.mxu0 %v779_v20  ;;  %v578_v1 = vor.u32 %v773_v62, %v575_v63 }
  0x1b   :  { %481 = vmatpush.bf16.msra.mxu1 %v787_v21 }
  0x1c   :  { %495 = vmatpush.bf16.msra.mxu2 %v795_v22 }
  0x1d   :  { %509 = vmatpush.bf16.msra.mxu3 %v803_v23 }
  0x1e   :  { %468 = vmatpush.bf16.msra.mxu0 %v778_v24 }
  0x1f   :  { %482 = vmatpush.bf16.msra.mxu1 %v786_v25 }
  0x20   :  { %496 = vmatpush.bf16.msra.mxu2 %v794_v26 }
  0x21   :  { %510 = vmatpush.bf16.msra.mxu3 %v802_v27 }
  0x22   :  { %469 = vmatpush.bf16.msra.mxu0 %v777_v28 }
  0x23   :  { %483 = vmatpush.bf16.msra.mxu1 %v785_v29 }
  0x24   :  { %497 = vmatpush.bf16.msra.mxu2 %v793_v30 }
  0x25   :  { %511 = vmatpush.bf16.msra.mxu3 %v801_v39  ;;  %470 = vmatmul.bf16.vlgmr.msra.gmra.mxu0 %v558_v42 }
  0x26   :  { %518 = vmatpush.bf16.msrb.mxu0 %v816_v31  ;;  %484 = vmatmul.bf16.vlgmr.msra.gmra.mxu1 %v562_v43 }
  0x27   :  { %532 = vmatpush.bf16.msrb.mxu1 %v824_v36  ;;  %498 = vmatmul.bf16.vlgmr.msra.gmra.mxu2 %v566_v44 }
  0x28   :  { %512 = vmatmul.bf16.vlgmr.msra.gmra.mxu3 %v570_v46 }
  0x2a   :  { %519 = vmatpush.bf16.msrb.mxu0 %v815_v45 }
  0x2b   :  { %533 = vmatpush.bf16.msrb.mxu1 %v823_v47 }
  0x2e   :  { %520 = vmatpush.bf16.msrb.mxu0 %v814_v48 }
  0x2f   :  { %534 = vmatpush.bf16.msrb.mxu1 %v822_v49 }
  0x32   :  { %521 = vmatpush.bf16.msrb.mxu0 %v813_v50 }
  0x33   :  { %535 = vmatpush.bf16.msrb.mxu1 %v821_v51 }
  0x36   :  { %522 = vmatpush.bf16.msrb.mxu0 %v812_v52 }
  0x37   :  { %536 = vmatpush.bf16.msrb.mxu1 %v820_v53 }
  0x3a   :  { %523 = vmatpush.bf16.msrb.mxu0 %v811_v54 }
  0x3b   :  { %537 = vmatpush.bf16.msrb.mxu1 %v819_v55 }
  0x3e   :  { %524 = vmatpush.bf16.msrb.mxu0 %v810_v56 }
  0x3f   :  { %538 = vmatpush.bf16.msrb.mxu1 %v818_v57 }
  0x42   :  { %525 = vmatpush.bf16.msrb.mxu0 %v809_v58 }
  0x43   :  { %539 = vmatpush.bf16.msrb.mxu1 %v817_v61 }
  0x45   :  { %526 = vmatmul.bf16.vlgmr.msrb.gmra.mxu0 %v574_v0 }
  0x46   :  { %540 = vmatmul.bf16.vlgmr.msrb.gmra.mxu1 %v578_v1 }
  0xa2   :  { %v471_v2 = vpop.f32.mrf.mxu0 }
  0xa3   :  { %v485_v3 = vpop.f32.mrf.mxu1 }
  0xa4   :  { %v486_v5 = vadd.f32 %v485_v3, %v471_v2 }
  0xaa   :  { %v499_v4 = vpop.f32.mrf.mxu2  ;;  %v473_v6 = vpop.f32.mrf.mxu0 }
  0xab   :  { %v487_v7 = vpop.f32.mrf.mxu1  ;;  %v513_v8 = vpop.f32.mrf.mxu3  ;;  %v500_v9 = vadd.f32 %v499_v4, %v486_v5 }
  0xac   :  { %v488_v11 = vadd.f32 %v487_v7, %v473_v6 }
  0xad   :  { %v514_v10 = vadd.f32 %v513_v8, %v500_v9 }
  0xb2   :  { %v501_v12 = vpop.f32.mrf.mxu2 }
  0xb3   :  { %v502_v17 = vadd.f32 %v501_v12, %v488_v11  ;;  %v515_v19 = vpop.f32.mrf.mxu3 }
  0xb5   :  { %v516_v21 = vadd.f32 %v515_v19, %v502_v17 }
  0xc2   :  { %v527_v13 = vpop.f32.mrf.mxu0 }
  0xc3   :  { %v528_v14 = vadd.f32 %v527_v13, %v514_v10  ;;  %v541_v16 = vpop.f32.mrf.mxu1 }
  0xc5   :  { %v542_v18 = vadd.f32 %v541_v16, %v528_v14 }
  0xc7   :  { %v546_v20 = vadd.f32 %v828_v15, %v542_v18 }
  0xc9   :  { %548 = vst [vmem:[%s929_s3] sm:$0xff] %v546_v20 }
  0xca   :  { %v529_v22 = vpop.f32.mrf.mxu0 }
  0xcb   :  { %v530_v23 = vadd.f32 %v529_v22, %v516_v21  ;;  %v543_v24 = vpop.f32.mrf.mxu1 }
  0xcd   :  { %v544_v25 = vadd.f32 %v543_v24, %v530_v23 }
  0xcf   :  { %v547_v26 = vadd.f32 %v828_v15, %v544_v25 }
  0xd1   :  { %549 = vst [vmem:[%s929_s3 + $0x8] sm:$0xff] %v547_v26 }
  0xd2   :  { %554 = vsyncpa [#allocation3], 1 }

</bundles_post_ra>
